<compile_context>
chip_gen: v7x
topology: tpu7x:2x2x1
jax: 0.10.0
libtpu: 0.0.40
codegen_flags: <defaults>
</compile_context>

<pallas_src>
import functools
from typing import Optional

import jax
import jax.numpy as jnp
from jax.experimental import pallas as pl
from jax.experimental.pallas import tpu as pltpu


# ---------------------------------------------------------------------------
# Kernels
# ---------------------------------------------------------------------------

def _final_layer_token_kernel(x_ref, c_ref, wsh_ref, wsc_ref, bsh_ref, bsc_ref,
                              wlin_ref, blin_ref, o_ref, *, eps: float,
                              inv_c: float, mxu_dtype):
    """Per-token conditioning: SiLU + modulation matmul done in-kernel."""
    x = x_ref[...].astype(jnp.float32)          # (tm, C)
    c = c_ref[...].astype(jnp.float32)          # (tm, C)

    # SiLU in f32 (EUP sigmoid); cast only the MXU operand.
    silu_c = (c * jax.nn.sigmoid(c)).astype(mxu_dtype)

    # AdaLN modulation: two (C, C) dots, f32 accumulation + f32 bias.
    shift = jnp.dot(silu_c, wsh_ref[...],
                    preferred_element_type=jnp.float32) + bsh_ref[...]
    scale = jnp.dot(silu_c, wsc_ref[...],
                    preferred_element_type=jnp.float32) + bsc_ref[...]

    # Single-pass LayerNorm statistics (sum & sum-of-squares, precomputed 1/C).
    s = jnp.sum(x, axis=-1, keepdims=True)
    s2 = jnp.sum(x * x, axis=-1, keepdims=True)
    mean = s * inv_c
    var = jnp.maximum(s2 * inv_c - mean * mean, 0.0)
    xn = (x - mean) * jax.lax.rsqrt(var + eps)

    # Modulate (f32), then cast for the final MXU projection.
    y = (xn * (1.0 + scale) + shift).astype(mxu_dtype)

    out = jnp.dot(y, wlin_ref[...],
                  preferred_element_type=jnp.float32) + blin_ref[...]
    o_ref[...] = out.astype(o_ref.dtype)


def _final_layer_sample_kernel(x_ref, shift_ref, scale_ref, wlin_ref, blin_ref,
                               o_ref, *, eps: float, inv_c: float, mxu_dtype):
    """Per-sample conditioning: shift/scale precomputed once per batch element."""
    x = x_ref[...].astype(jnp.float32)              # (tm, C)
    shift = shift_ref[...].astype(jnp.float32)      # (1, C), broadcasts over rows
    scale = scale_ref[...].astype(jnp.float32)      # (1, C)

    s = jnp.sum(x, axis=-1, keepdims=True)
    s2 = jnp.sum(x * x, axis=-1, keepdims=True)
    mean = s * inv_c
    var = jnp.maximum(s2 * inv_c - mean * mean, 0.0)
    xn = (x - mean) * jax.lax.rsqrt(var + eps)

    y = (xn * (1.0 + scale) + shift).astype(mxu_dtype)
    out = jnp.dot(y, wlin_ref[...],
                  preferred_element_type=jnp.float32) + blin_ref[...]
    o_ref[...] = out.astype(o_ref.dtype)


# ---------------------------------------------------------------------------
# Sizing helpers
# ---------------------------------------------------------------------------

def _round_up(v: int, m: int) -> int:
    return ((v + m - 1) // m) * m


def _vmem_capacity_bytes() -> int:
    try:
        return int(pltpu.get_tpu_info().vmem_capacity_bytes)
    except Exception:
        return 64 << 20       # conservative fallback (v7x per-TensorCore VMEM)


_TILE_CANDIDATES = (1024, 768, 512, 384, 256, 192, 128, 96, 64, 32, 16, 8)


def _vmem_need(tm: int, C: int, O_pad: int, act_b: int, mxu_b: int,
               *, per_token: bool) -> int:
    """Honest per-step VMEM footprint: double-buffered DMA tiles, resident
    weights, and the f32 in-kernel intermediates."""
    need = 2 * tm * C * act_b                          # x tile (2 bufs)
    if per_token:
        need += 2 * tm * C * act_b                     # c tile (2 bufs)
        need += 2 * C * C * mxu_b + 2 * C * 4          # w_shift/w_scale + biases
        inter_rows = 7                                 # x,c,silu_c,shift,scale,xn,y
    else:
        need += 2 * 2 * C * 4                          # shift/scale (1,C) blocks
        inter_rows = 4                                 # x, xn, y, slack
    need += 2 * tm * O_pad * act_b                     # out tile (2 bufs)
    need += C * O_pad * mxu_b + O_pad * 4              # w_lin_p, b_lin_p residents
    need += inter_rows * tm * C * 4 + 2 * tm * O_pad * 4   # f32 temporaries
    return need


def _choose_tile_m(m_rows: int, desired: Optional[int], need_fn, budget: int) -> int:
    """Largest standard row tile (multiple of 8) fitting the VMEM budget."""
    cap = max(8, _round_up(m_rows, 8))
    if desired is not None:
        return max(8, min(_round_up(desired, 8), cap))
    for cand in _TILE_CANDIDATES:
        if cand <= cap and need_fn(cand) <= budget:
            return cand
    return 8


_RESIDENT = pl.BlockSpec(memory_space=pltpu.MemorySpace.VMEM)


# ---------------------------------------------------------------------------
# Parameter preparation (hoisted out of the per-call path)
# ---------------------------------------------------------------------------

def prepare_dit_final_layer_params(w_mod, b_mod, w_lin, b_lin, *,
                                   mxu_dtype=jnp.bfloat16):
    """Precompute casts / splits / lane-dense padding once at setup time.

    w_mod: (C, 2C), b_mod: (2C,), w_lin: (C, O), b_lin: (O,)
    (already transposed for y = x @ W + b, i.e. PyTorch weight.T).
    """
    C = w_mod.shape[0]
    O = w_lin.shape[1]
    O_pad = _round_up(max(O, 128), 128)      # lane-dense output width
    return dict(
        C=C, O=O, O_pad=O_pad, mxu_dtype=mxu_dtype,
        # f32 copies for the hoisted per-sample modulation (done in XLA).
        w_mod_f32=w_mod.astype(jnp.float32),
        b_mod_f32=b_mod.astype(jnp.float32),
        # Split modulation weights for the per-token in-kernel path.
        w_shift=w_mod[:, :C].astype(mxu_dtype),
        w_scale=w_mod[:, C:].astype(mxu_dtype),
        b_shift=b_mod[:C].reshape(1, C).astype(jnp.float32),
        b_scale=b_mod[C:].reshape(1, C).astype(jnp.float32),
        # Zero-padded, lane-dense final projection.
        w_lin_p=jnp.zeros((C, O_pad), mxu_dtype).at[:, :O].set(
            w_lin.astype(mxu_dtype)),
        b_lin_p=jnp.zeros((1, O_pad), jnp.float32).at[:, :O].set(
            b_lin.astype(jnp.float32)),
    )


# ---------------------------------------------------------------------------
# Apply paths
# ---------------------------------------------------------------------------

def _apply_per_token(x, c, p, tile_m, eps):
    B, N, C = x.shape
    O, O_pad, mxu_dtype = p["O"], p["O_pad"], p["mxu_dtype"]
    M = B * N

    x2 = x.reshape(M, C)
    c2 = c.reshape(M, C)

    act_b = jnp.dtype(x.dtype).itemsize
    mxu_b = jnp.dtype(mxu_dtype).itemsize
    budget = max(_vmem_capacity_bytes() - (16 << 20), 24 << 20)
    need_fn = functools.partial(_vmem_need, C=C, O_pad=O_pad, act_b=act_b,
                                mxu_b=mxu_b, per_token=True)
    tm = _choose_tile_m(M, tile_m, need_fn, budget)
    vmem_limit = int(min(budget, max(need_fn(tm) + (8 << 20), 32 << 20)))

    cost = pl.CostEstimate(
        flops=int(2 * M * C * (2 * C + O_pad) + 10 * M * C),
        transcendentals=int(M * C + 2 * M),
        bytes_accessed=int(x2.nbytes + c2.nbytes
                           + (2 * C * C + C * O_pad) * mxu_b
                           + (2 * C + O_pad) * 4
                           + M * O_pad * act_b),
    )

    kernel = functools.partial(_final_layer_token_kernel, eps=eps,
                               inv_c=1.0 / C, mxu_dtype=mxu_dtype)

    out2 = pl.pallas_call(
        kernel,
        out_shape=jax.ShapeDtypeStruct((M, O_pad), x.dtype),
        grid_spec=pltpu.PrefetchScalarGridSpec(
            num_scalar_prefetch=0,
            grid=(pl.cdiv(M, tm),),                      # ragged last tile OK
            in_specs=[
                pl.BlockSpec((tm, C), lambda i: (i, 0)),  # x row-tile
                pl.BlockSpec((tm, C), lambda i: (i, 0)),  # c row-tile
                _RESIDENT,                                # w_shift (C, C)
                _RESIDENT,                                # w_scale (C, C)
                _RESIDENT,                                # b_shift (1, C)
                _RESIDENT,                                # b_scale (1, C)
                _RESIDENT,                                # w_lin_p (C, O_pad)
                _RESIDENT,                                # b_lin_p (1, O_pad)
            ],
            out_specs=pl.BlockSpec((tm, O_pad), lambda i: (i, 0)),
        ),
        compiler_params=pltpu.CompilerParams(
            dimension_semantics=("parallel",),
            vmem_limit_bytes=vmem_limit),
        cost_estimate=cost,
    )(x2, c2, p["w_shift"], p["w_scale"], p["b_shift"], p["b_scale"],
      p["w_lin_p"], p["b_lin_p"])

    return out2[:, :O].reshape(B, N, O)


def _apply_per_sample(x, c, p, tile_m, eps):
    B, N, C = x.shape
    O, O_pad, mxu_dtype = p["O"], p["O_pad"], p["mxu_dtype"]

    # Hoisted modulation: SiLU(c) @ w_mod + b_mod once per batch element (XLA).
    c2 = c.reshape(B, C).astype(jnp.float32)
    silu = c2 * jax.nn.sigmoid(c2)
    mod = silu @ p["w_mod_f32"] + p["b_mod_f32"]        # (B, 2C), tiny
    shift = mod[:, :C].reshape(B, 1, C)
    scale = mod[:, C:].reshape(B, 1, C)

    act_b = jnp.dtype(x.dtype).itemsize
    mxu_b = jnp.dtype(mxu_dtype).itemsize
    budget = max(_vmem_capacity_bytes() - (16 << 20), 24 << 20)
    need_fn = functools.partial(_vmem_need, C=C, O_pad=O_pad, act_b=act_b,
                                mxu_b=mxu_b, per_token=False)
    tm = _choose_tile_m(N, tile_m, need_fn, budget)
    vmem_limit = int(min(budget, max(need_fn(tm) + (8 << 20), 32 << 20)))

    M = B * N
    cost = pl.CostEstimate(
        flops=int(2 * M * C * O_pad + 8 * M * C),
        transcendentals=int(2 * M),
        bytes_accessed=int(x.nbytes + 2 * B * C * 4
                           + C * O_pad * mxu_b + O_pad * 4
                           + M * O_pad * act_b),
    )

    kernel = functools.partial(_final_layer_sample_kernel, eps=eps,
                               inv_c=1.0 / C, mxu_dtype=mxu_dtype)

    out3 = pl.pallas_call(
        kernel,
        out_shape=jax.ShapeDtypeStruct((B, N, O_pad), x.dtype),
        grid_spec=pltpu.PrefetchScalarGridSpec(
            num_scalar_prefetch=0,
            grid=(B, pl.cdiv(N, tm)),                    # ragged last tile OK
            in_specs=[
                pl.BlockSpec((None, tm, C), lambda b, i: (b, i, 0)),   # x
                pl.BlockSpec((None, 1, C), lambda b, i: (b, 0, 0)),    # shift
                pl.BlockSpec((None, 1, C), lambda b, i: (b, 0, 0)),    # scale
                _RESIDENT,                                             # w_lin_p
                _RESIDENT,                                             # b_lin_p
            ],
            out_specs=pl.BlockSpec((None, tm, O_pad), lambda b, i: (b, i, 0)),
        ),
        compiler_params=pltpu.CompilerParams(
            dimension_semantics=("parallel", "parallel"),
            vmem_limit_bytes=vmem_limit),
        cost_estimate=cost,
    )(x, shift, scale, p["w_lin_p"], p["b_lin_p"])

    return out3[..., :O]


def dit_final_layer_apply(x, c, params, *, tile_m=None, eps=1e-6):
    """x: (B,N,C). c: (B,N,C) per-token, or (B,C)/(B,1,C) per-sample."""
    B, N, C = x.shape
    per_sample = (c.ndim == 2) or (c.ndim == 3 and c.shape[1] == 1 and N != 1)
    if per_sample:
        return _apply_per_sample(x, c, params, tile_m, eps)
    assert c.shape == x.shape, "per-token conditioning must match x's shape"
    return _apply_per_token(x, c, params, tile_m, eps)


def dit_final_layer(x, c, w_mod, b_mod, w_lin, b_lin, *, tile_m=None, eps=1e-6,
                    mxu_dtype=jnp.bfloat16):
    """Convenience wrapper: prep params (prefer prepare_* once) then apply."""
    params = prepare_dit_final_layer_params(w_mod, b_mod, w_lin, b_lin,
                                            mxu_dtype=mxu_dtype)
    return dit_final_layer_apply(x, c, params, tile_m=tile_m, eps=eps)


# ---------------------------------------------------------------------------
# Pure-JAX reference (matches the PyTorch forward)
# ---------------------------------------------------------------------------

def _reference(x, c, w_mod, b_mod, w_lin, b_lin, eps=1e-6):
    x32 = x.astype(jnp.float32)
    c32 = c.astype(jnp.float32)
    silu_c = c32 * jax.nn.sigmoid(c32)
    mod = silu_c @ w_mod + b_mod
    C = x.shape[-1]
    shift, scale = mod[..., :C], mod[..., C:]
    mean = jnp.mean(x32, axis=-1, keepdims=True)
    var = jnp.mean((x32 - mean) ** 2, axis=-1, keepdims=True)
    xn = (x32 - mean) / jnp.sqrt(var + eps)
    y = xn * (1.0 + scale) + shift
    return (y @ w_lin + b_lin).astype(x.dtype)


if __name__ == "__main__":
    B, N, C, O = 2, 20, 32, 16   # batch, seq (non-multiple of tile), hidden, out

    key = jax.random.PRNGKey(0)
    kx, kc, ks, k1, k2, k3, k4 = jax.random.split(key, 7)

    x = jax.random.normal(kx, (B, N, C), dtype=jnp.float32)
    c = jax.random.normal(kc, (B, N, C), dtype=jnp.float32)         # per-token
    c_sample = jax.random.normal(ks, (B, 1, C), dtype=jnp.float32)  # per-sample

    # Parameters (stored already transposed for y = x @ W + b).
    w_mod = jax.random.normal(k1, (C, 2 * C), dtype=jnp.float32) * 0.02
    b_mod = jax.random.normal(k2, (2 * C,), dtype=jnp.float32) * 0.02
    w_lin = jax.random.normal(k3, (C, O), dtype=jnp.float32) * 0.02
    b_lin = jax.random.normal(k4, (O,), dtype=jnp.float32) * 0.02

    # Prepare parameters ONCE (hoisted out of the per-call path).
    params_f32 = prepare_dit_final_layer_params(w_mod, b_mod, w_lin, b_lin,
                                                mxu_dtype=jnp.float32)
    params_bf16 = prepare_dit_final_layer_params(w_mod, b_mod, w_lin, b_lin,
                                                 mxu_dtype=jnp.bfloat16)

    # --- 1) Per-token conditioning, f32 MXU path, explicit tile -> ragged grid.
    ref = _reference(x, c, w_mod, b_mod, w_lin, b_lin)
    out_f32 = jax.block_until_ready(
        dit_final_layer_apply(x, c, params_f32, tile_m=16))
    assert out_f32.shape == (B, N, O)
    assert jnp.allclose(out_f32, ref, atol=1e-4, rtol=1e-4), "f32 path mismatch"

    # --- 2) Per-token conditioning, default bf16 MXU path, auto tile.
    out_bf16 = jax.block_until_ready(dit_final_layer_apply(x, c, params_bf16))
    assert out_bf16.shape == (B, N, O)
    assert jnp.allclose(out_bf16, ref, atol=3e-2, rtol=3e-2), "bf16 path mismatch"

    # --- 3) Per-sample conditioning (hoisted modulation), f32 path.
    ref_s = _reference(x, jnp.broadcast_to(c_sample, x.shape),
                       w_mod, b_mod, w_lin, b_lin)
    out_s = jax.block_until_ready(
        dit_final_layer_apply(x, c_sample, params_f32, tile_m=16))
    assert out_s.shape == (B, N, O)
    assert jnp.allclose(out_s, ref_s, atol=1e-4, rtol=1e-4), "per-sample mismatch"

    print("KERNEL_OK")
</pallas_src>

<mosaic_0001>
module attributes {stable_mosaic.version = 11 : i64} {
  func.func @_final_layer_token_kernel(%arg0: i32, %arg1: memref<16x32xf32, #tpu.memory_space<vmem>>, %arg2: memref<16x32xf32, #tpu.memory_space<vmem>>, %arg3: memref<32x32xf32, #tpu.memory_space<vmem>>, %arg4: memref<32x32xf32, #tpu.memory_space<vmem>>, %arg5: memref<1x32xf32, #tpu.memory_space<vmem>>, %arg6: memref<1x32xf32, #tpu.memory_space<vmem>>, %arg7: memref<32x128xf32, #tpu.memory_space<vmem>>, %arg8: memref<1x128xf32, #tpu.memory_space<vmem>>, %arg9: memref<16x128xf32, #tpu.memory_space<vmem>>) attributes {dimension_semantics = [#tpu.dimension_semantics<parallel>], iteration_bounds = array<i64: 3>, scalar_prefetch = 0 : i64, scratch_operands = 0 : i64, tpu.core_type = #tpu.core_type<tc>, window_params = [{transform_indices = @transform_0, window_bounds = array<i64: 16, 32>}, {transform_indices = @transform_1, window_bounds = array<i64: 16, 32>}, {pipeline_mode = #tpu.pipeline_mode<synchronous>, transform_indices = @transform_2, window_bounds = array<i64: 32, 32>}, {pipeline_mode = #tpu.pipeline_mode<synchronous>, transform_indices = @transform_3, window_bounds = array<i64: 32, 32>}, {pipeline_mode = #tpu.pipeline_mode<synchronous>, transform_indices = @transform_4, window_bounds = array<i64: 1, 32>}, {pipeline_mode = #tpu.pipeline_mode<synchronous>, transform_indices = @transform_5, window_bounds = array<i64: 1, 32>}, {pipeline_mode = #tpu.pipeline_mode<synchronous>, transform_indices = @transform_6, window_bounds = array<i64: 32, 128>}, {pipeline_mode = #tpu.pipeline_mode<synchronous>, transform_indices = @transform_7, window_bounds = array<i64: 1, 128>}, {transform_indices = @transform_8, window_bounds = array<i64: 16, 128>}]} {
    %c0 = arith.constant 0 : index
    %c0_0 = arith.constant 0 : index
    %0 = vector.load %arg1[%c0, %c0_0] : memref<16x32xf32, #tpu.memory_space<vmem>>, vector<16x32xf32>
    %c0_1 = arith.constant 0 : index
    %c0_2 = arith.constant 0 : index
    %1 = vector.load %arg2[%c0_1, %c0_2] : memref<16x32xf32, #tpu.memory_space<vmem>>, vector<16x32xf32>
    %2 = arith.negf %1 : vector<16x32xf32>
    %3 = math.exp %2 : vector<16x32xf32>
    %cst = arith.constant 1.000000e+00 : f32
    %4 = vector.broadcast %cst : f32 to vector<16x32xf32>
    %5 = arith.addf %4, %3 : vector<16x32xf32>
    %6 = arith.divf %4, %5 : vector<16x32xf32>
    %7 = arith.mulf %1, %6 : vector<16x32xf32>
    %c0_3 = arith.constant 0 : index
    %c0_4 = arith.constant 0 : index
    %8 = vector.load %arg3[%c0_3, %c0_4] : memref<32x32xf32, #tpu.memory_space<vmem>>, vector<32x32xf32>
    %cst_5 = arith.constant dense<0.000000e+00> : vector<16x32xf32>
    %9 = tpu.matmul %7, %8, %cst_5 {dimension_numbers = #tpu.dot_dimension_numbers<[1], [0], [0], [1], [0, 0, 1, 1], [], []>} : vector<16x32xf32>, vector<32x32xf32>, vector<16x32xf32> -> vector<16x32xf32>
    %c0_6 = arith.constant 0 : index
    %c0_7 = arith.constant 0 : index
    %10 = vector.load %arg5[%c0_6, %c0_7] : memref<1x32xf32, #tpu.memory_space<vmem>>, vector<1x32xf32>
    %11 = vector.broadcast %10 : vector<1x32xf32> to vector<16x32xf32>
    %12 = arith.addf %9, %11 : vector<16x32xf32>
    %c0_8 = arith.constant 0 : index
    %c0_9 = arith.constant 0 : index
    %13 = vector.load %arg4[%c0_8, %c0_9] : memref<32x32xf32, #tpu.memory_space<vmem>>, vector<32x32xf32>
    %cst_10 = arith.constant dense<0.000000e+00> : vector<16x32xf32>
    %14 = tpu.matmul %7, %13, %cst_10 {dimension_numbers = #tpu.dot_dimension_numbers<[1], [0], [0], [1], [0, 0, 1, 1], [], []>} : vector<16x32xf32>, vector<32x32xf32>, vector<16x32xf32> -> vector<16x32xf32>
    %c0_11 = arith.constant 0 : index
    %c0_12 = arith.constant 0 : index
    %15 = vector.load %arg6[%c0_11, %c0_12] : memref<1x32xf32, #tpu.memory_space<vmem>>, vector<1x32xf32>
    %16 = vector.broadcast %15 : vector<1x32xf32> to vector<16x32xf32>
    %17 = arith.addf %14, %16 : vector<16x32xf32>
    %cst_13 = arith.constant dense<0.000000e+00> : vector<16xf32>
    %18 = vector.multi_reduction <add>, %0, %cst_13 [1] : vector<16x32xf32> to vector<16xf32>
    %19 = vector.shape_cast %18 : vector<16xf32> to vector<16x1xf32>
    %20 = arith.mulf %0, %0 : vector<16x32xf32>
    %cst_14 = arith.constant dense<0.000000e+00> : vector<16xf32>
    %21 = vector.multi_reduction <add>, %20, %cst_14 [1] : vector<16x32xf32> to vector<16xf32>
    %22 = vector.shape_cast %21 : vector<16xf32> to vector<16x1xf32>
    %cst_15 = arith.constant 3.125000e-02 : f32
    %23 = vector.broadcast %cst_15 : f32 to vector<16x1xf32>
    %24 = arith.mulf %19, %23 : vector<16x1xf32>
    %cst_16 = arith.constant 3.125000e-02 : f32
    %25 = vector.broadcast %cst_16 : f32 to vector<16x1xf32>
    %26 = arith.mulf %22, %25 : vector<16x1xf32>
    %27 = arith.mulf %24, %24 : vector<16x1xf32>
    %28 = arith.subf %26, %27 : vector<16x1xf32>
    %cst_17 = arith.constant 0.000000e+00 : f32
    %29 = vector.broadcast %cst_17 : f32 to vector<16x1xf32>
    %30 = arith.maximumf %28, %29 : vector<16x1xf32>
    %31 = vector.broadcast %24 : vector<16x1xf32> to vector<16x32xf32>
    %32 = arith.subf %0, %31 : vector<16x32xf32>
    %cst_18 = arith.constant 9.99999997E-7 : f32
    %33 = vector.broadcast %cst_18 : f32 to vector<16x1xf32>
    %34 = arith.addf %30, %33 : vector<16x1xf32>
    %35 = math.rsqrt %34 : vector<16x1xf32>
    %36 = vector.broadcast %35 : vector<16x1xf32> to vector<16x32xf32>
    %37 = arith.mulf %32, %36 : vector<16x32xf32>
    %cst_19 = arith.constant 1.000000e+00 : f32
    %38 = vector.broadcast %cst_19 : f32 to vector<16x32xf32>
    %39 = arith.addf %38, %17 : vector<16x32xf32>
    %40 = arith.mulf %37, %39 : vector<16x32xf32>
    %41 = arith.addf %40, %12 : vector<16x32xf32>
    %c0_20 = arith.constant 0 : index
    %c0_21 = arith.constant 0 : index
    %42 = vector.load %arg7[%c0_20, %c0_21] : memref<32x128xf32, #tpu.memory_space<vmem>>, vector<32x128xf32>
    %cst_22 = arith.constant dense<0.000000e+00> : vector<16x128xf32>
    %43 = tpu.matmul %41, %42, %cst_22 {dimension_numbers = #tpu.dot_dimension_numbers<[1], [0], [0], [1], [0, 0, 1, 1], [], []>} : vector<16x32xf32>, vector<32x128xf32>, vector<16x128xf32> -> vector<16x128xf32>
    %c0_23 = arith.constant 0 : index
    %c0_24 = arith.constant 0 : index
    %44 = vector.load %arg8[%c0_23, %c0_24] : memref<1x128xf32, #tpu.memory_space<vmem>>, vector<1x128xf32>
    %45 = vector.broadcast %44 : vector<1x128xf32> to vector<16x128xf32>
    %46 = arith.addf %43, %45 : vector<16x128xf32>
    %c0_25 = arith.constant 0 : index
    %c0_26 = arith.constant 0 : index
    %47 = vector.load %arg9[%c0_25, %c0_26] : memref<16x128xf32, #tpu.memory_space<vmem>>, vector<16x128xf32>
    tpu.vector_store %arg9[%c0_25, %c0_26], %46 {strides = array<i32>} : memref<16x128xf32, #tpu.memory_space<vmem>>, vector<16x128xf32>,
    return
  }
  func.func @transform_0(%arg0: i32) -> (i32, i32) {
    %c0_i32 = arith.constant 0 : i32
    %c0_i32_0 = arith.constant 0 : i32
    return %arg0, %c0_i32 : i32, i32
  }
  func.func @transform_1(%arg0: i32) -> (i32, i32) {
    %c0_i32 = arith.constant 0 : i32
    %c0_i32_0 = arith.constant 0 : i32
    return %arg0, %c0_i32 : i32, i32
  }
  func.func @transform_2(%arg0: i32) -> (i32, i32) {
    %c0_i32 = arith.constant 0 : i32
    %c0_i32_0 = arith.constant 0 : i32
    %c0_i32_1 = arith.constant 0 : i32
    return %c0_i32, %c0_i32_0 : i32, i32
  }
  func.func @transform_3(%arg0: i32) -> (i32, i32) {
    %c0_i32 = arith.constant 0 : i32
    %c0_i32_0 = arith.constant 0 : i32
    %c0_i32_1 = arith.constant 0 : i32
    return %c0_i32, %c0_i32_0 : i32, i32
  }
  func.func @transform_4(%arg0: i32) -> (i32, i32) {
    %c0_i32 = arith.constant 0 : i32
    %c0_i32_0 = arith.constant 0 : i32
    %c0_i32_1 = arith.constant 0 : i32
    return %c0_i32, %c0_i32_0 : i32, i32
  }
  func.func @transform_5(%arg0: i32) -> (i32, i32) {
    %c0_i32 = arith.constant 0 : i32
    %c0_i32_0 = arith.constant 0 : i32
    %c0_i32_1 = arith.constant 0 : i32
    return %c0_i32, %c0_i32_0 : i32, i32
  }
  func.func @transform_6(%arg0: i32) -> (i32, i32) {
    %c0_i32 = arith.constant 0 : i32
    %c0_i32_0 = arith.constant 0 : i32
    %c0_i32_1 = arith.constant 0 : i32
    return %c0_i32, %c0_i32_0 : i32, i32
  }
  func.func @transform_7(%arg0: i32) -> (i32, i32) {
    %c0_i32 = arith.constant 0 : i32
    %c0_i32_0 = arith.constant 0 : i32
    %c0_i32_1 = arith.constant 0 : i32
    return %c0_i32, %c0_i32_0 : i32, i32
  }
  func.func @transform_8(%arg0: i32) -> (i32, i32) {
    %c0_i32 = arith.constant 0 : i32
    %c0_i32_0 = arith.constant 0 : i32
    return %arg0, %c0_i32 : i32, i32
  }
}

</mosaic_0001>

<bundles_post_ra>
// kernel: tpu_custom_call.1
= control target key start
LH: loop header
LB: loop body
LE: loop exit
PB: predicated region body
PF: predicated region fallthrough
CT: control target
= control target key end

     0   :  { %13 = vsyncpa [#allocation3], 0  ;;  %s1252_s0 = inlined_call_operand.vmem [shape: f32[40,32], index: 0, kind: input, shape index: {}]   ;;  %s1253_s1 = inlined_call_operand.vmem [shape: f32[40,32], index: 1, kind: input, shape index: {}]   ;;  %s1254_s2 = inlined_call_operand.vmem [shape: f32[32,32], index: 2, kind: input, shape index: {}]   ;;  %s1255_s3 = inlined_call_operand.vmem [shape: f32[32,32], index: 3, kind: input, shape index: {}]   ;;  %s1256_s4 = inlined_call_operand.vmem [shape: f32[1,32], index: 4, kind: input, shape index: {}]   ;;  %s1257_s5 = inlined_call_operand.vmem [shape: f32[1,32], index: 5, kind: input, shape index: {}]   ;;  %s1258_s6 = inlined_call_operand.vmem [shape: f32[32,128], index: 6, kind: input, shape index: {}]   ;;  %s1259_s7 = inlined_call_operand.vmem [shape: f32[1,128], index: 7, kind: input, shape index: {}]   ;;  %s1260_s8 = inlined_call_operand.hbm [shape: f32[40,128], index: 8, kind: output, shape index: {}]  }
   0x1   :  { %15 = vsyncpa [#allocation3 + $0x1], 0  ;;  %s1065_s27 = smov 0   ;;  %s1067_s28 = smov 0  }
   0x2   :  { %s1069_s29 = smov 0   ;;  %s1071_s30 = smov 0  }
   0x3 LB: > { %s1086_s9 = sadd.s32 4294967295, %s1015_s30   ;;  %s796_s10 = sadd.s32 4294967294, %s1015_s30   ;;  %s1015_s30 = sphi %s1071_s30, %s1266_s30   ;;  %s1011_s29 = sphi %s1069_s29, %s1265_s29   ;;  %s1007_s28 = sphi %s1067_s28, %s1264_s28   ;;  %s1003_s27 = sphi %s1065_s27, %s1263_s27  }
   0x4   : > { %s1090_s11 = sadd.s32 1, %s1015_s30   ;;  %s206_s12 = sadd.s32 1, %s1011_s29 }
   0x5   : > { %s203_s13 = ssub.s32 %s1015_s30, %s1090_s11  ;;  %p216_p0 = scmp.ne.s32.totalorder %s1011_s29, %s1007_s28 }
   0x6   : > { %p204_p1 = scmp.eq.s32.totalorder %s203_s13, 0  ;;  %p217_p2 = scmp.eq.s32.totalorder %s1086_s9, 2 }
   0x7   : > { %p222_p3 = scmp.ne.s32.totalorder %s1007_s28, %s1003_s27  ;;  %p223_p4 = scmp.eq.s32.totalorder %s796_s10, 2 }
   0x8   : > { %s1101_s14 = scalar_select %p204_p1, %s1011_s29, %s206_s12  }
   0x9   : > { %p1103_p5 = por %p217_p2, %p216_p0  ;;  %p1107_p6 = por %p223_p4, %p222_p3 }
   0xa   : > { %p799_p7 = scmp.ge.s32.totalorder %s1015_s30, 1  ;;  %p293_p8 = scmp.lt.s32.totalorder %s1015_s30, 4 }
   0xc   : > { %p294_p9 = pnand %p799_p7, %p293_p8 }
   0xd   : > { %v484_v0 = vld [vmem:[%s1255_s3] sm:$0xff] (!%p294_p9)  ;;  %v485_v1 = vld [vmem:[%s1255_s3 + $0x8] sm:$0xff] (!%p294_p9)  ;;  %s1123_s23 = sshll.u32 (!%p294_p9), %s1086_s9, 1  ;;  %v486_v5 = vld [vmem:[%s1255_s3 + $0x10] sm:$0xff] (!%p294_p9)  ;;  %vm402_vm0 = vcmask (!%p294_p9), 261120   ;;  %s337_s17 = sand.u32 (!%p294_p9), 1, %s1007_s28  }
   0xe   : > { %297 = sbr.rel (%p294_p9) target bundleno = 521 (0x209), region = 52  ;;  %v391_v2 = vld [vmem:[%s1254_s2] sm:$0xff] (!%p294_p9)  ;;  %v885_v3 = vpack.c.bf16 (!%p294_p9), %v485_v1, %v484_v0  ;;  %v392_v4 = vld [vmem:[%s1254_s2 + $0x8] sm:$0xff] (!%p294_p9)  ;;  %v487_v6 = vld [vmem:[%s1255_s3 + $0x18] sm:$0xff] (!%p294_p9)  ;;  %p345_p10 = scmp.lt.s32.totalorder (!%p294_p9), %s1123_s23, 4 }
   0xf   : > { %v877_v7 = vpack.c.bf16 (!%p294_p9), %v392_v4, %v391_v2  ;;  %v889_v8 = vpack.c.bf16 (!%p294_p9), %v487_v6, %v486_v5  ;;  %v393_v9 = vld [vmem:[%s1254_s2 + $0x10] sm:$0xff] (!%p294_p9)  ;;  %v394_v10 = vld [vmem:[%s1254_s2 + $0x18] sm:$0xff] (!%p294_p9)  ;;  %v608_v32 = vld [vmem:[%s1258_s6] sm:$0xff] (!%p294_p9)  ;;  %s800_s18 = sshll.u32 (!%p294_p9), %s337_s17, 4 }
  0x10   : > { %886 = vmatprep.subr.bf16.mxu1 (!%p294_p9), %v885_v3  ;;  %v881_v11 = vpack.c.bf16 (!%p294_p9), %v394_v10, %v393_v9  ;;  %v609_v33 = vld [vmem:[%s1258_s6 + $0x8] sm:$0xff] (!%p294_p9)  ;;  %v610_v35 = vld [vmem:[%s1258_s6 + $0x10] sm:$0xff] (!%p294_p9)  ;;  %v611_v36 = vld [vmem:[%s1258_s6 + $0x18] sm:$0xff] (!%p294_p9) }
  0x11   : > { %888 = vmatpush3.bf16.msra.mxu1 (!%p294_p9), %v885_v3  ;;  %878 = vmatprep.subr.bf16.mxu0 (!%p294_p9), %v877_v7  ;;  %v893_v34 = vpack.c.bf16 (!%p294_p9), %v609_v33, %v608_v32  ;;  %v897_v37 = vpack.c.bf16 (!%p294_p9), %v611_v36, %v610_v35  ;;  %v810_v54 = vld [vmem:[%s1257_s5] ss:$0 sm:$0xff] (!%p294_p9) }
  0x12   : > { %880 = vmatpush3.bf16.msra.mxu0 (!%p294_p9), %v877_v7  ;;  %890 = vmatprep.subr.bf16.mxu1 (!%p294_p9), %v889_v8  ;;  %v807_v60 = vld [vmem:[%s1256_s4] ss:$0 sm:$0xff] (!%p294_p9) }
  0x13   : > { %882 = vmatprep.subr.bf16.mxu0 (!%p294_p9), %v881_v11 }
  0x15   : > { %s346_s21 = scalar_select %p345_p10, %s1123_s23, 4  ;;  %892 = vmatpush3.bf16.msra.mxu1 %v889_v8 }
  0x16   : > { %884 = vmatpush3.bf16.msra.mxu0 %v881_v11  ;;  %s711_s24 = ssub.s32 (%p1103_p5), 5, %s1123_s23 }
  0x17   : > { %s802_s22 = sshll.u32 %s346_s21, 3  ;;  %894 = vmatprep.subr.bf16.mxu0 %v893_v34  ;;  %s339_s21 = scalar_lea.vmem [#allocation2], %s800_s18 }
  0x18   : > { %s362_s26 = scalar_lea.vmem %s1253_s1, %s802_s22  ;;  %s348_s13 = scalar_lea.vmem %s1252_s0, %s802_s22 }
  0x19   : > { %v375_v12 = vld [vmem:[%s362_s26] sm:$0xff]  ;;  %v376_v13 = vld [vmem:[%s362_s26 + $0x8] sm:$0xff]  ;;  %s1192_s22 = scalar_lea.sflag [#allocation3], %s337_s17  ;;  %p712_p11 = scmp.lt.s32.totalorder (%p1103_p5), %s711_s24, 2 }
  0x1a   : > { %v1148_v14 = vld [vmem:[%s348_s13] sm:$0xff]  ;;  %v805_v15 = vmul.f32 -1.442695, %v375_v12  ;;  %v806_v16 = vmul.f32 -1.442695, %v376_v13  ;;  %v1154_v19 = vld [vmem:[%s348_s13 + $0x8] sm:$0xff] }
  0x1b   : > { %v570_v17 = vsel %vm402_vm0, %v1148_v14, 0.0  ;;  %v576_v18 = vmul.f32 %v1148_v14, %v1148_v14  ;;  %v577_v20 = vmul.f32 %v1154_v19, %v1154_v19  ;;  %v573_v22 = vsel %vm402_vm0, %v1154_v19, 0.0 }
  0x1c   : > { %571 = vadd.xlane.f32.xlu0 %v570_v17  ;;  %941 = vpow2.f32 %v805_v15 }
  0x1d   : > { %v578_v21 = vsel %vm402_vm0, %v576_v18, 0.0  ;;  %943 = vpow2.f32 %v806_v16  ;;  %v581_v23 = vsel %vm402_vm0, %v577_v20, 0.0 }
  0x1e   : > { %579 = vadd.xlane.f32.xlu1 %v578_v21 }
  0x20   : > { %574 = vadd.xlane.f32.xlu0 %v573_v22 }
  0x22   : > { %582 = vadd.xlane.f32.xlu1 %v581_v23 }
  0x26   : > { %v942_v24 = vpop.eup %941 }
  0x27   : > { %v944_v25 = vpop.eup %943  ;;  %v383_v26 = vadd.f32 1.0, %v942_v24 }
  0x28   : > { %v384_v27 = vadd.f32 1.0, %v944_v25 }
  0x29   : > { %945 = vrcp.f32 %v383_v26 }
  0x2a   : > { %947 = vrcp.f32 %v384_v27 }
  0x33   : > { %v946_v28 = vpop.eup %945 }
  0x34   : > { %v948_v29 = vpop.eup %947  ;;  %v389_v30 = vmul.f32 %v946_v28, %v375_v12  ;;  %v813_v12 = vld [vmem:[%s1259_s7] ss:$0 sm:$0xff] }
  0x35   : > { %v390_v31 = vmul.f32 %v948_v29, %v376_v13 }
  0x36   : > { %863 = vmatprep.mubr.msk.f32.mxu1 %vm402_vm0, %v389_v30  ;;  %852 = vmatprep.mubr.msk.f32.mxu0 %vm402_vm0, %v389_v30 }
  0x37   : > { %864 = vmatmul.mubr.msk.f32.vlgmr.msra.gmra.mrb[0].mxu1 %vm402_vm0, %v390_v31  ;;  %853 = vmatmul.mubr.msk.f32.vlgmr.msra.gmra.mrb[0].mxu0 %vm402_vm0, %v390_v31 }
  0x38   : > { %896 = vmatpush3.bf16.msra.mxu0 %v893_v34 }
  0x39   : > { %898 = vmatprep.subr.bf16.mxu0 %v897_v37 }
  0x3c   : > { %900 = vmatpush3.bf16.msra.mxu0 %v897_v37 }
  0xa9   : > { %v572_v38 = vpop.xlane.xlu0 %571 }
  0xaa   : > { %v584_v42 = vmul.f32 0.03125, %v572_v38 }
  0xab   : > { %v580_v39 = vpop.xlane.xlu1 %579 }
  0xac   : > { %v588_v46 = vmul.f32 %v584_v42, %v584_v42  ;;  %v586_v47 = vmul.f32 0.03125, %v580_v39  ;;  %v594_v57 = vsub.f32 %v1148_v14, %v584_v42 }
  0xad   : > { %v575_v40 = vpop.xlane.xlu0 %574 }
  0xae   : > { %v585_v41 = vmul.f32 0.03125, %v575_v40  ;;  %v590_v49 = vsub.f32 %v586_v47, %v588_v46 }
  0xaf   : > { %v583_v43 = vpop.xlane.xlu1 %582 }
  0xb0   : > { %v589_v44 = vmul.f32 %v585_v41, %v585_v41  ;;  %v587_v45 = vmul.f32 0.03125, %v583_v43  ;;  %v592_v51 = vmax.f32 %v590_v49, 0.0  ;;  %v595_v55 = vsub.f32 %v1154_v19, %v585_v41 }
  0xb2   : > { %v591_v48 = vsub.f32 %v587_v45, %v589_v44  ;;  %v596_v53 = vadd.f32 1e-06, %v592_v51 }
  0xb4   : > { %v593_v50 = vmax.f32 %v591_v48, 0.0 }
  0xb6   : > { %v597_v52 = vadd.f32 1e-06, %v593_v50 }
  0xb8   : > { %949 = vrsqrt.f32 %v597_v52 }
  0xb9   : > { %951 = vrsqrt.f32 %v596_v53 }
  0xc2   : > { %v950_v56 = vpop.eup %949 }
  0xc3   : > { %v952_v61 = vpop.eup %951  ;;  %v601_v2 = vmul.f32 %v950_v56, %v595_v55 }
  0xc4   : > { %v600_v5 = vmul.f32 %v952_v61, %v594_v57 }
 0x10a   : > { %v865_v58 = vpop.f32.mrb[0].mxu1  ;;  %v854_v59 = vpop.f32.mrb[0].mxu0 }
 0x10b   : > { %v567_v62 = vadd.f32 %v865_v58, %v810_v54  ;;  %v561_v63 = vpop.f32.mrb[1].mxu1  ;;  %v475_v0 = vpop.f32.mrb[1].mxu0  ;;  %v481_v4 = vadd.f32 %v854_v59, %v807_v60 }
 0x10c   : > { %v562_v1 = vadd.f32 %v810_v54, %v561_v63  ;;  %v476_v7 = vadd.f32 %v807_v60, %v475_v0 }
 0x10d   : > { %v603_v3 = vadd.f32 1.0, %v567_v62 }
 0x10e   : > { %v602_v6 = vadd.f32 1.0, %v562_v1 }
 0x10f   : > { %v605_v8 = vmul.f32 %v603_v3, %v601_v2 }
 0x110   : > { %v604_v9 = vmul.f32 %v602_v6, %v600_v5 }
 0x111   : > { %v607_v10 = vadd.f32 %v605_v8, %v481_v4 }
 0x112   : > { %v606_v11 = vadd.f32 %v604_v9, %v476_v7 }
 0x114   : > { %874 = vmatprep.mubr.msk.f32.mxu0 %vm402_vm0, %v606_v11 }
 0x115   : > { %875 = vmatmul.mubr.msk.f32.vlgmr.msra.gmra.mrb[2].mxu0 %vm402_vm0, %v607_v10 }
 0x1e6   : > { %709 = sbr.rel (!%p1103_p5) target bundleno = 521 (0x209), region = 56 }
 0x1e8   : > { %v876_v13 = vpop.f32.mrb[2].mxu0 }
 0x1e9   : > { %v697_v14 = vadd.f32 %v876_v13, %v813_v12  ;;  %v691_v15 = vpop.f32.mrb[3].mxu0 }
 0x1ea   : > { %v692_v16 = vadd.f32 %v813_v12, %v691_v15 }
 0x1eb   : > { %701 = vst [vmem:[%s339_s21 + $0x8] sm:$0xff] %v697_v14 }
 0x1ec   : > { %700 = vst [vmem:[%s339_s21] sm:$0xff] %v692_v16 }
 0x1ed   : > { %s1268_s24 = smov (!%p712_p11, %s711_s24), 2 }
 0x1ee   : > { %s1197_s25 = sshll.u32 %s1268_s24, 7 }
 0x1ef   : > { %s716_s26 = ssub.s32 256, %s1197_s25 }
 0x1f0   : > { %717 = vsyncadd %s1192_s22, %s716_s26  ;;  %p819_p12 = scmp.ne.s32.totalorder %s1197_s25, 0  ;;  %s825_s10 = sshll.u32 %s1086_s9, 8 }
 0x1f1   : > { %s1206_s15 = scalar_lea.hbm %s1260_s8, %s825_s10  ;;  %s722_s17 = sshll.u32 %s339_s21, 4  ;;  %s1208_s17 = int_to_ptr.vmem [resolvable:$true] %s722_s17 }
 0x1f2   : > { %s953_s23 = scalar_lea.vmem %s1208_s17, %s1197_s25  ;;  %s1017_s18 = smov [#allocation2]  }
 0x1f3   : > { %p954_p13 = scmp.ne.s32.totalorder %s1208_s17, %s953_s23  ;;  %s957_s19 = sshll.u32 %s1017_s18, 4  ;;  %s958_s19 = int_to_ptr.vmem [resolvable:$false] %s957_s19 }
 0x1f4   : > { %s959_s9 = scalar_lea.vmem %s958_s19, 512  ;;  %p960_p2 = scmp.lt.s32.totalorder %s1208_s17, %s958_s19 }
 0x1f5   : > { %p955_p0 = pnand %p954_p13, %p819_p12  ;;  %p961_p3 = scmp.lt.s32.totalorder %s959_s9, %s953_s23 }
 0x1f7   : > { %p956_p1 = pneg %p955_p0  ;;  %p962_p4 = por %p961_p3, %p960_p2 }
 0x1f9   : > { %p963_p5 = pnand %p962_p4, %p956_p1 }
 0x1fb   : > { %966 = shalt.err (!%p963_p5)
}
 0x1fc   : > { %s967_s20 = scalar_lea.hbm %s1206_s15, %s1197_s25  ;;  %s971_s26 = scalar_lea.hbm %s1260_s8, 640 }
 0x1fd   : > { %p968_p7 = scmp.ne.s32.totalorder %s1206_s15, %s967_s20  ;;  %p972_p10 = scmp.lt.u32.totalorder %s1206_s15, %s1260_s8 }
 0x1fe   : > { %p973_p11 = scmp.lt.u32.totalorder %s971_s26, %s967_s20  ;;  %p975_p0 = scmp.lt.u32.totalorder %s967_s20, %s1206_s15 }
 0x1ff   : > { %p969_p8 = pnand %p968_p7, %p819_p12 }
 0x200   : > { %p974_p13 = por %p973_p11, %p972_p10 }
 0x201   : > { %p970_p9 = pneg %p969_p8 }
 0x202   : > { %p976_p1 = por %p975_p0, %p974_p13 }
 0x204   : > { %p977_p2 = pnand %p976_p1, %p970_p9 }
 0x206   : > { %980 = shalt.err (!%p977_p2)
}
 0x207   : > { %s1018_s13 = smov 128   ;;  %s1019_s23 = smov 8  }
 0x208   : > { %728 = dma.vmem_to_hbm [thread:$0]  (%p819_p12), %s1208_s17, %s1197_s25, %s1206_s15, %s1192_s22, %s1018_s13, %s1018_s13, %s1019_s23  }
 0x209 PF: > { %p906_p3 = scmp.ge.s32.totalorder %s1015_s30, 2  ;;  %s737_s18 = sand.u32 1, %s1003_s27  }
 0x20a   : > { %s738_s19 = scalar_lea.sflag [#allocation3], %s737_s18 }
 0x20b   : > { %p903_p4 = pnand %p906_p3, %p1107_p6 }
 0x20d   : > { %998 = dma.done.wait (!%p903_p4), %s738_s19, 256  }
 0x20e   : > { %1000 = vsyncadd (!%p903_p4), %s738_s19, 4294967040  ;;  %p18_p5 = scmp.ge.s32.totalorder %s1090_s11, 5   ;;  %s1263_s27 = smov %s1007_s28 }
 0x20f   : > { %s1264_s28 = smov %s1011_s29  ;;  %s1265_s29 = smov %s1101_s14 }
 0x210   : > { %s1266_s30 = smov %s1090_s11  ;;  %20 = sbr.rel (!%p18_p5) target bundleno = 3 (0x3), region = 90 }
 0x217   :  { %743 = vsyncpa [#allocation3], 1 }
 0x218   :  { %745 = vsyncpa [#allocation3 + $0x1], 1 }

</bundles_post_ra>
